<compile_context>
chip_gen: v5e
topology: v5e:2x2
jax: 0.10.0
libtpu: 0.0.40
codegen_flags: <defaults>
</compile_context>

<pallas_src>
import functools

import jax
import jax.numpy as jnp
from jax.experimental import pallas as pl
from jax.experimental.pallas import tpu as pltpu


# ---------------------------------------------------------------------------
# kernels
# ---------------------------------------------------------------------------

def se_fused_kernel(x_ref, w1_ref, w2_ref, o_ref, *, inv_hw):
    """Bb batch items per grid step: pool + excitation + scale, fused."""
    x = x_ref[...]                                             # (Bb, C, HW)
    # squeeze: mean over the spatial axis, widened inside the reduce
    y = jnp.sum(x, axis=2, dtype=jnp.float32) * inv_hw         # (Bb, C)
    # excitation: FC -> ReLU -> FC -> Sigmoid (tiny next to the HBM traffic)
    h = jnp.maximum(
        jnp.dot(y, w1_ref[...], preferred_element_type=jnp.float32), 0.0)
    s = jax.nn.sigmoid(
        jnp.dot(h, w2_ref[...], preferred_element_type=jnp.float32))  # (Bb, C)
    # scale: keep the big multiply in the native dtype
    o_ref[...] = x * s.astype(x.dtype)[:, :, None]


def se_gate_kernel(x_ref, w1_ref, w2_ref, g_ref, acc_ref, *,
                   hw, hw_tile, inv_hw, ragged):
    """Split path, pass 1: accumulate HW sums per tile, emit gate (B, C)."""
    t = pl.program_id(1)

    @pl.when(t == 0)
    def _():
        acc_ref[...] = jnp.zeros_like(acc_ref)

    x = x_ref[...]                                             # (1, C, hw_tile)
    if ragged:  # last tile sticks past HW -> zero the padding lanes
        lane = jax.lax.broadcasted_iota(jnp.int32, x.shape, 2) + t * hw_tile
        x = jnp.where(lane < hw, x, jnp.zeros_like(x))
    acc_ref[...] += jnp.sum(x, axis=2, dtype=jnp.float32)

    @pl.when(t == pl.num_programs(1) - 1)
    def _():
        y = acc_ref[...] * inv_hw                              # (1, C)
        h = jnp.maximum(
            jnp.dot(y, w1_ref[...], preferred_element_type=jnp.float32), 0.0)
        g_ref[...] = jax.nn.sigmoid(
            jnp.dot(h, w2_ref[...], preferred_element_type=jnp.float32))


def se_scale_kernel(g_ref, x_ref, o_ref):
    """Split path, pass 2: channel-wise rescale of one (1, C, hw_tile) tile."""
    x = x_ref[...]
    o_ref[...] = x * g_ref[...].astype(x.dtype)[:, :, None]


# ---------------------------------------------------------------------------
# wrapper
# ---------------------------------------------------------------------------

def _vmem_budget():
    """Generation-aware usable VMEM for this kernel's buffers (bytes)."""
    try:
        cap = int(pltpu.get_tpu_info().vmem_capacity_bytes)
    except Exception:                                  # pragma: no cover
        cap = 64 << 20              # conservative default (v7x physical size)
    # leave headroom for Mosaic scratch/metadata: 48 MiB on v7x, 96 MiB on v5e/v6e
    return max(16 << 20, (cap * 3) // 4)


def _pick_hw_tile(hw, budget_elems):
    """Lane-aligned (128) HW tile fitting the per-block element budget."""
    if hw <= max(budget_elems, 128):
        return hw                                    # can't / needn't split
    # prefer an aligned divisor of HW (no ragged tail) that fits the budget
    t = (budget_elems // 128) * 128
    while t >= 128:
        if hw % t == 0:
            return t
        t -= 128
    # none divides: largest aligned tile within budget (cdiv grid + masking)
    return max(128, (budget_elems // 128) * 128)


def se_layer(x, w1_t, w2_t, *, max_block_bytes=None):
    """SE forward.  x: (B, C, H, W); w1_t: (C, C//r); w2_t: (C//r, C)."""
    B, C, H, W = x.shape
    HW = H * W
    Cr = w1_t.shape[1]
    itemsize = x.dtype.itemsize
    weight_bytes = 2 * C * Cr * w1_t.dtype.itemsize

    x3 = x.reshape(B, C, HW)                 # free: no HBM relayout
    usable = _vmem_budget()
    slack = 2 << 20

    # per-block VMEM multiplier: 2x input + 2x output double buffers
    # + a possibly f32-widened reduce temp (4/itemsize input-blocks worth).
    mult = 4.0 + 4.0 / itemsize
    block_budget = int(max(1, (usable - 2 * weight_bytes - slack) / mult))
    if max_block_bytes is not None:          # test hook / manual override
        block_budget = min(block_budget, int(max_block_bytes))

    item_bytes = C * HW * itemsize
    cost = pl.CostEstimate(
        flops=4 * B * C * Cr + 2 * B * C * HW,
        transcendentals=B * C,
        bytes_accessed=2 * B * C * HW * itemsize + 2 * weight_bytes,
    )

    if item_bytes <= block_budget:
        # -------- fused single pass: (Bb, C, HW) blocks over the batch ------
        bb = max(1, min(B, block_budget // max(1, item_bytes)))
        if B >= 2:                 # keep >= 2 parallel steps for v7x megacore
            bb = min(bb, -(-B // 2))
        grid_b = pl.cdiv(B, bb)
        block_bytes = bb * item_bytes
        need = int(4 * block_bytes + bb * C * HW * 4 + 2 * weight_bytes + slack)

        x_spec = pl.BlockSpec((bb, C, HW), lambda b: (b, 0, 0))
        out3 = pl.pallas_call(
            functools.partial(se_fused_kernel, inv_hw=1.0 / HW),
            out_shape=jax.ShapeDtypeStruct(x3.shape, x.dtype),
            grid=(grid_b,),
            in_specs=[
                x_spec,
                pl.BlockSpec((C, Cr), lambda b: (0, 0)),
                pl.BlockSpec((Cr, C), lambda b: (0, 0)),
            ],
            out_specs=x_spec,
            compiler_params=pltpu.CompilerParams(
                dimension_semantics=("parallel",),
                vmem_limit_bytes=int(min(max(need, 16 << 20), usable)),
            ),
            cost_estimate=cost,
        )(x3, w1_t, w2_t)
    else:
        # -------- split path: gate kernel (HW reduction) + scale kernel -----
        budget_hw = block_budget // max(1, C * itemsize)
        hw_tile = _pick_hw_tile(HW, budget_hw)
        T = pl.cdiv(HW, hw_tile)
        ragged = (HW % hw_tile) != 0
        tile_bytes = C * hw_tile * itemsize
        need = int(4 * tile_bytes + C * hw_tile * 4 + 2 * weight_bytes
                   + 4 * C * 4 + slack)
        vmem_bytes = int(min(max(need, 16 << 20), usable))

        x_spec = pl.BlockSpec((1, C, hw_tile), lambda b, t: (b, 0, t))
        g_spec = pl.BlockSpec((1, C), lambda b, t: (b, 0))

        gate_cost = pl.CostEstimate(
            flops=4 * B * C * Cr + B * C * HW,
            transcendentals=B * C,
            bytes_accessed=B * C * HW * itemsize + 2 * weight_bytes,
        )
        gates = pl.pallas_call(
            functools.partial(se_gate_kernel, hw=HW, hw_tile=hw_tile,
                              inv_hw=1.0 / HW, ragged=ragged),
            out_shape=jax.ShapeDtypeStruct((B, C), jnp.float32),
            grid=(B, T),
            in_specs=[
                x_spec,
                pl.BlockSpec((C, Cr), lambda b, t: (0, 0)),
                pl.BlockSpec((Cr, C), lambda b, t: (0, 0)),
            ],
            out_specs=g_spec,
            scratch_shapes=[pltpu.VMEM((1, C), jnp.float32)],
            compiler_params=pltpu.CompilerParams(
                dimension_semantics=("parallel", "arbitrary"),
                vmem_limit_bytes=vmem_bytes,
            ),
            cost_estimate=gate_cost,
        )(x3, w1_t, w2_t)

        scale_cost = pl.CostEstimate(
            flops=B * C * HW,
            transcendentals=0,
            bytes_accessed=2 * B * C * HW * itemsize + B * C * 4,
        )
        out3 = pl.pallas_call(
            se_scale_kernel,
            out_shape=jax.ShapeDtypeStruct(x3.shape, x.dtype),
            grid=(B, T),
            in_specs=[g_spec, x_spec],
            out_specs=x_spec,
            compiler_params=pltpu.CompilerParams(
                dimension_semantics=("parallel", "parallel"),
                vmem_limit_bytes=vmem_bytes,
            ),
            cost_estimate=scale_cost,
        )(gates, x3)

    return out3.reshape(B, C, H, W)


# ---------------------------------------------------------------------------
# reference & test
# ---------------------------------------------------------------------------

def se_reference(x, w1_t, w2_t):
    """Plain-JAX reference mirroring the PyTorch forward."""
    y = jnp.mean(x, axis=(2, 3))                       # (B, C)
    h = jnp.maximum(y @ w1_t, 0.0)                     # (B, C//r)
    s = jax.nn.sigmoid(h @ w2_t)                       # (B, C)
    return x * s[:, :, None, None]


def _make_inputs(key, B, C, H, W, reduction):
    Cr = C // reduction
    kx, k1, k2 = jax.random.split(key, 3)
    x = jax.random.normal(kx, (B, C, H, W), dtype=jnp.float32)
    # PyTorch nn.Linear stores (out, in); transpose for y @ W^T semantics.
    w1 = jax.random.normal(k1, (Cr, C), dtype=jnp.float32) * 0.2
    w2 = jax.random.normal(k2, (C, Cr), dtype=jnp.float32) * 0.2
    return x, w1.T, w2.T


if __name__ == "__main__":
    key = jax.random.PRNGKey(0)
    k0, k1, k2 = jax.random.split(key, 3)

    # 1) primary small-shape test (channel=8, reduction=4): fused path.
    x, w1_t, w2_t = _make_inputs(k0, B=2, C=8, H=16, W=16, reduction=4)
    out = jax.block_until_ready(se_layer(x, w1_t, w2_t))
    ref = se_reference(x, w1_t, w2_t)
    assert out.shape == x.shape
    assert jnp.allclose(out, ref, atol=1e-5, rtol=1e-5), "fused path mismatch"

    # 2) force the split (gate + scale) path with a tiny per-block budget.
    out_split = jax.block_until_ready(
        se_layer(x, w1_t, w2_t, max_block_bytes=4096))
    assert jnp.allclose(out_split, ref, atol=1e-5, rtol=1e-5), "split mismatch"

    # 3) split path with a ragged (non-dividing) HW tile -> masked reduction.
    xr, w1r, w2r = _make_inputs(k2, B=2, C=8, H=18, W=18, reduction=4)
    out_r = jax.block_until_ready(se_layer(xr, w1r, w2r, max_block_bytes=4096))
    ref_r = se_reference(xr, w1r, w2r)
    assert jnp.allclose(out_r, ref_r, atol=1e-5, rtol=1e-5), "ragged mismatch"

    # 4) large-C / tiny-HW shape (typical SE block): fused, no HBM transpose.
    x2, w1b, w2b = _make_inputs(k1, B=2, C=128, H=7, W=7, reduction=4)
    out2 = jax.block_until_ready(se_layer(x2, w1b, w2b))
    ref2 = se_reference(x2, w1b, w2b)
    assert jnp.allclose(out2, ref2, atol=1e-5, rtol=1e-5), "large-C mismatch"

    print("KERNEL_OK")
</pallas_src>

<mosaic_0001>
module attributes {stable_mosaic.version = 11 : i64} {
  func.func @se_fused_kernel(%arg0: i32, %arg1: memref<1x8x256xf32, #tpu.memory_space<vmem>>, %arg2: memref<8x2xf32, #tpu.memory_space<vmem>>, %arg3: memref<2x8xf32, #tpu.memory_space<vmem>>, %arg4: memref<1x8x256xf32, #tpu.memory_space<vmem>>) attributes {dimension_semantics = [#tpu.dimension_semantics<parallel>], iteration_bounds = array<i64: 2>, scalar_prefetch = 0 : i64, scratch_operands = 0 : i64, tpu.core_type = #tpu.core_type<tc>, window_params = [{transform_indices = @transform_0, window_bounds = array<i64: 1, 8, 256>}, {pipeline_mode = #tpu.pipeline_mode<synchronous>, transform_indices = @transform_1, window_bounds = array<i64: 8, 2>}, {pipeline_mode = #tpu.pipeline_mode<synchronous>, transform_indices = @transform_2, window_bounds = array<i64: 2, 8>}, {transform_indices = @transform_3, window_bounds = array<i64: 1, 8, 256>}]} {
    %c0 = arith.constant 0 : index
    %c0_0 = arith.constant 0 : index
    %c0_1 = arith.constant 0 : index
    %0 = vector.load %arg1[%c0, %c0_0, %c0_1] : memref<1x8x256xf32, #tpu.memory_space<vmem>>, vector<1x8x256xf32>
    %cst = arith.constant dense<0.000000e+00> : vector<1x8xf32>
    %1 = vector.multi_reduction <add>, %0, %cst [2] : vector<1x8x256xf32> to vector<1x8xf32>
    %cst_2 = arith.constant 3.906250e-03 : f32
    %2 = vector.broadcast %cst_2 : f32 to vector<1x8xf32>
    %3 = arith.mulf %1, %2 : vector<1x8xf32>
    %c0_3 = arith.constant 0 : index
    %c0_4 = arith.constant 0 : index
    %4 = vector.load %arg2[%c0_3, %c0_4] : memref<8x2xf32, #tpu.memory_space<vmem>>, vector<8x2xf32>
    %cst_5 = arith.constant dense<0.000000e+00> : vector<1x2xf32>
    %5 = tpu.matmul %3, %4, %cst_5 {dimension_numbers = #tpu.dot_dimension_numbers<[1], [0], [0], [1], [0, 0, 1, 1], [], []>} : vector<1x8xf32>, vector<8x2xf32>, vector<1x2xf32> -> vector<1x2xf32>
    %cst_6 = arith.constant 0.000000e+00 : f32
    %6 = vector.broadcast %cst_6 : f32 to vector<1x2xf32>
    %7 = arith.maximumf %5, %6 : vector<1x2xf32>
    %c0_7 = arith.constant 0 : index
    %c0_8 = arith.constant 0 : index
    %8 = vector.load %arg3[%c0_7, %c0_8] : memref<2x8xf32, #tpu.memory_space<vmem>>, vector<2x8xf32>
    %cst_9 = arith.constant dense<0.000000e+00> : vector<1x8xf32>
    %9 = tpu.matmul %7, %8, %cst_9 {dimension_numbers = #tpu.dot_dimension_numbers<[1], [0], [0], [1], [0, 0, 1, 1], [], []>} : vector<1x2xf32>, vector<2x8xf32>, vector<1x8xf32> -> vector<1x8xf32>
    %10 = arith.negf %9 : vector<1x8xf32>
    %11 = math.exp %10 : vector<1x8xf32>
    %cst_10 = arith.constant 1.000000e+00 : f32
    %12 = vector.broadcast %cst_10 : f32 to vector<1x8xf32>
    %13 = arith.addf %12, %11 : vector<1x8xf32>
    %14 = arith.divf %12, %13 : vector<1x8xf32>
    %15 = vector.shape_cast %14 : vector<1x8xf32> to vector<1x8x1xf32>
    %16 = vector.broadcast %15 : vector<1x8x1xf32> to vector<1x8x256xf32>
    %17 = arith.mulf %0, %16 : vector<1x8x256xf32>
    %c0_11 = arith.constant 0 : index
    %c0_12 = arith.constant 0 : index
    %c0_13 = arith.constant 0 : index
    %18 = vector.load %arg4[%c0_11, %c0_12, %c0_13] : memref<1x8x256xf32, #tpu.memory_space<vmem>>, vector<1x8x256xf32>
    tpu.vector_store %arg4[%c0_11, %c0_12, %c0_13], %17 {strides = array<i32>} : memref<1x8x256xf32, #tpu.memory_space<vmem>>, vector<1x8x256xf32>,
    return
  }
  func.func @transform_0(%arg0: i32) -> (i32, i32, i32) {
    %c0_i32 = arith.constant 0 : i32
    %c0_i32_0 = arith.constant 0 : i32
    %c0_i32_1 = arith.constant 0 : i32
    return %arg0, %c0_i32, %c0_i32_0 : i32, i32, i32
  }
  func.func @transform_1(%arg0: i32) -> (i32, i32) {
    %c0_i32 = arith.constant 0 : i32
    %c0_i32_0 = arith.constant 0 : i32
    %c0_i32_1 = arith.constant 0 : i32
    return %c0_i32, %c0_i32_0 : i32, i32
  }
  func.func @transform_2(%arg0: i32) -> (i32, i32) {
    %c0_i32 = arith.constant 0 : i32
    %c0_i32_0 = arith.constant 0 : i32
    %c0_i32_1 = arith.constant 0 : i32
    return %c0_i32, %c0_i32_0 : i32, i32
  }
  func.func @transform_3(%arg0: i32) -> (i32, i32, i32) {
    %c0_i32 = arith.constant 0 : i32
    %c0_i32_0 = arith.constant 0 : i32
    %c0_i32_1 = arith.constant 0 : i32
    return %arg0, %c0_i32, %c0_i32_0 : i32, i32, i32
  }
}

</mosaic_0001>

<bundles_post_ra>
// kernel: tpu_custom_call.1
= control target key start
LH: loop header
LB: loop body
LE: loop exit
PB: predicated region body
PF: predicated region fallthrough
CT: control target
= control target key end

     0   :  { %8 = vsyncpa [#allocation3], 0  ;;  %s696_s0 = inlined_call_operand.hbm [shape: f32[2,8,256], index: 0, kind: input, shape index: {}]   ;;  %s697_s1 = inlined_call_operand.vmem [shape: f32[8,2], index: 1, kind: input, shape index: {}]   ;;  %s698_s2 = inlined_call_operand.vmem [shape: f32[2,8], index: 2, kind: input, shape index: {}]   ;;  %s699_s3 = inlined_call_operand.hbm [shape: f32[2,8,256], index: 3, kind: output, shape index: {}]  }
   0x1   :  { %10 = vsyncpa [#allocation3 + $0x1], 0 }
   0x2   :  { %11 = vsyncpa [#allocation4], 0 }
   0x3   :  { %13 = vsyncpa [#allocation4 + $0x1], 0  ;;  %s559_s12 = smov 0   ;;  %s561_s13 = smov 0  }
   0x4   :  { %s563_s14 = smov 0   ;;  %s565_s15 = smov 0  }
   0x5 LB: > { %s580_s16 = sadd.s32 4294967295, %s537_s15   ;;  %s370_s17 = sadd.s32 4294967294, %s537_s15   ;;  %s537_s15 = sphi %s565_s15, %s709_s15   ;;  %s533_s14 = sphi %s563_s14, %s708_s14   ;;  %s529_s13 = sphi %s561_s13, %s707_s13   ;;  %s525_s12 = sphi %s559_s12, %s706_s12  }
   0x6   : > { %s584_s18 = sadd.s32 1, %s537_s15   ;;  %s26_s19 = sadd.s32 1, %s533_s14 }
   0x7   : > { %s23_s20 = ssub.s32 %s537_s15, %s584_s18  ;;  %p33_p0 = scmp.ne.s32.totalorder %s533_s14, %s529_s13 }
   0x8   : > { %p24_p1 = scmp.eq.s32.totalorder %s23_s20, 0  ;;  %p34_p2 = scmp.eq.s32.totalorder %s537_s15, 0 }
   0x9   : > { %p39_p3 = scmp.ne.s32.totalorder %s529_s13, %s525_s12  ;;  %p40_p4 = scmp.eq.s32.totalorder %s580_s16, 0 }
   0xa   : > { %s596_s21 = scalar_select %p24_p1, %s533_s14, %s26_s19  }
   0xb   : > { %p598_p5 = por %p34_p2, %p33_p0  ;;  %p602_p6 = por %p40_p4, %p39_p3 }
   0xc   : > { %p105_p7 = scmp.eq.s32.totalorder %s580_s16, 1  ;;  %p111_p8 = scmp.eq.s32.totalorder %s370_s17, 1 }
   0xd   : > { %p402_p10 = scmp.lt.s32.totalorder %s537_s15, 2  ;;  %s137_s26 = sand.u32 1, %s533_s14  }
   0xe   : > { %p609_p11 = por %p105_p7, %p33_p0  ;;  %p613_p12 = por %p111_p8, %p39_p3 }
   0xf   : > { %s388_s27 = sshll.u32 %s537_s15, 4  ;;  %s373_s28 = sshll.u32 %s137_s26, 4 }
  0x10   : > { %s146_s4 = scalar_lea.hbm %s696_s0, %s388_s27  ;;  %s141_s6 = scalar_lea.vmem [#allocation2], %s373_s28 }
  0x11   : > { %s148_s5 = sshll.u32 %s146_s4, 4  ;;  %s150_s7 = sshll.u32 %s141_s6, 4  ;;  %s149_s5 = int_to_ptr.hbm [resolvable:$true] %s148_s5  ;;  %s151_s7 = int_to_ptr.vmem [resolvable:$true] %s150_s7 }
  0x12   : > { %p624_p13 = pnand %p402_p10, %p598_p5  ;;  %p376_p0 = scmp.ge.s32.totalorder %s537_s15, 1 }
  0x13   : > { %p155_p1 = scmp.lt.s32.totalorder %s537_s15, 3  ;;  %s138_s9 = scalar_lea.sflag [#allocation3], %s137_s26 }
  0x14   : > { %s441_s10 = sshra.s32 %s149_s5, 4  ;;  %p445_p3 = pneg %p624_p13  ;;  %s442_s10 = int_to_ptr.hbm [resolvable:$true] %s441_s10 }
  0x15   : > { %s443_s11 = scalar_lea.hbm %s442_s10, 16  ;;  %s448_s20 = scalar_lea.hbm %s696_s0, 32 }
  0x16   : > { %p444_p2 = scmp.ne.s32.totalorder %s442_s10, %s443_s11  ;;  %p449_p5 = scmp.lt.s32.totalorder %s442_s10, %s696_s0 }
  0x17   : > { %p450_p8 = scmp.lt.s32.totalorder %s448_s20, %s443_s11 }
  0x18   : > { %p446_p4 = pnand %p445_p3, %p444_p2 }
  0x19   : > { %p451_p10 = por %p450_p8, %p449_p5 }
  0x1a   : > { %p447_p7 = pneg %p446_p4 }
  0x1c   : > { %p452_p9 = pnand %p451_p10, %p447_p7 }
  0x1e   : > { %455 = shalt.err (!%p452_p9)
}
  0x1f   : > { %397 = dma.hbm_to_vmem [thread:$0]  (!%p624_p13), %s149_s5, 256, %s151_s7, %s138_s9  }
  0x20   : > { %p156_p2 = pnand %p376_p0, %p155_p1 }
  0x21   : > { %s645_s26 = sand.u32 (!%p156_p2), 1, %s529_s13  }
  0x22   : > { %159 = sbr.rel (%p156_p2) target bundleno = 568 (0x238), region = 32  ;;  %s377_s28 = sshll.u32 (!%p156_p2), %s645_s26, 4 }
  0x23   : > { %s162_s29 = scalar_lea.sflag (!%p156_p2), [#allocation3], %s645_s26  ;;  %s165_s30 = scalar_lea.vmem (!%p156_p2), [#allocation2], %s377_s28 }
  0x27   : > { %516 = dma.done.wait (%p602_p6), %s162_s29, 256  }
  0x28   : > { %518 = vsyncadd (%p602_p6), %s162_s29, 4294967040  ;;  %v189_v0 = vld [vmem:[%s165_s30] sm:$0xff]  ;;  %v190_v1 = vld [vmem:[%s165_s30 + $0x8] sm:$0xff]  ;;  %v197_v4 = vlaneseq  ;;  %vm200_vm0 = vcmask 64512   ;;  %vm229_vm1 = vcmask 1041408   ;;  %vm225_vm2 = vcmask 15360  }
  0x29   : > { %v191_v2 = vadd.f32 %v190_v1, %v189_v0  ;;  %v195_v3 = vld [vmem:[%s697_s1] sm:$0xff]  ;;  %s389_s23 = sshll.u32 %s580_s16, 4  ;;  %s188_s11 = scalar_lea.vmem [#allocation5], %s377_s28 }
  0x2a   : > { %218 = vmatpush.msra.mxu0 %v195_v3  ;;  %v198_v5 = vand.u32 127, %v197_v4  ;;  %v224_v9 = vld [vmem:[%s698_s2] sm:$0x3]  ;;  %v274_v12 = vshrl.u32 %v197_v4, 7  ;;  %s295_s10 = scalar_lea.hbm %s699_s3, %s389_s23  ;;  %s297_s17 = sshll.u32 %s188_s11, 4  ;;  %s298_s17 = int_to_ptr.vmem [resolvable:$true] %s297_s17 }
  0x2b   : > { %192 = vadd.xlane.f32.xlu0 %v191_v2  ;;  %380 = vmatpush.msk.msra.mxu1 %vm229_vm1, %v224_v9  ;;  %s299_s19 = sshll.u32 %s295_s10, 4  ;;  %s284_s20 = scalar_lea.sflag [#allocation4], %s645_s26  ;;  %s300_s19 = int_to_ptr.hbm [resolvable:$true] %s299_s19 }
  0x2c   : > { %436 = vset.pattern.permute.xlu0 %v274_v12  ;;  %s485_s22 = sshra.s32 %s300_s19, 4  ;;  %s491_s28 = scalar_lea.hbm %s699_s3, 32  ;;  %s486_s22 = int_to_ptr.hbm [resolvable:$true] %s485_s22 }
  0x2d   : > { %s487_s16 = scalar_lea.hbm %s486_s22, 16  ;;  %p492_p0 = scmp.lt.s32.totalorder %s486_s22, %s699_s3 }
  0x2e   : > { %p488_p6 = scmp.ne.s32.totalorder %s486_s22, %s487_s16  ;;  %p493_p1 = scmp.lt.s32.totalorder %s491_s28, %s487_s16 }
  0x30   : > { %p489_p9 = pnand %p488_p6, %p609_p11  ;;  %p494_p3 = por %p493_p1, %p492_p0 }
  0x32   : > { %p490_p13 = pneg %p489_p9 }
  0x34   : > { %p495_p4 = pnand %p494_p3, %p490_p13 }
  0x9e   : > { %v193_v6 = vpop.xlane.xlu0 %192 }
  0x9f   : > { %v194_v7 = vmul.f32 0.00390625, %v193_v6 }
  0xa1   : > { %v199_v8 = vperm.slane %v194_v7, %v198_v5 }
  0xa3   : > { %379 = vmatmul.msk.f32.vlgmr.msra.gmra.mxu0 %vm200_vm0, %v199_v8 }
 0x120   : > { %v220_v10 = vpop.f32.mrf.mxu0 }
 0x121   : > { %v223_v11 = vmax.f32 %v220_v10, 0.0 }
 0x123   : > { %381 = vmatmul.msk.f32.vlgmr.msra.gmra.mxu1 %vm225_vm2, %v223_v11 }
 0x1a0   : > { %v250_v13 = vpop.f32.mrf.mxu1 }
 0x1a1   : > { %v382_v14 = vmul.f32 -1.442695, %v250_v13 }
 0x1a3   : > { %437 = vpow2.f32 %v382_v14 }
 0x1a9   : > { %v438_v15 = vpop.eup %437 }
 0x1aa   : > { %v256_v16 = vadd.f32 1.0, %v438_v15 }
 0x1ac   : > { %439 = vrcp.f32 %v256_v16  ;;  %v268_v20 = vand.u32 2147483648, %v256_v16  ;;  %v266_v22 = vand.u32 2147483647, %v256_v16  ;;  %vm262_vm4 = vweird.f32 %v256_v16 }
 0x1ae   : > { %v269_v24 = vor.u32 1.1754944e-38, %v268_v20  ;;  %vm267_vm6 = vcmp.eq.f32.partialorder %v266_v22, 8.507059e+37 }
 0x1b2   : > { %v440_v17 = vpop.eup %439 }
 0x1b3   : > { %v258_v18 = vmul.f32 %v440_v17, %v256_v16  ;;  %vm263_vm3 = vweird.f32 %v440_v17 }
 0x1b4   : > { %vm264_vm5 = vmor %vm262_vm4, %vm263_vm3 }
 0x1b5   : > { %v259_v19 = vsub.f32 1.0, %v258_v18 }
 0x1b7   : > { %v260_v21 = vmul.f32 %v440_v17, %v259_v19 }
 0x1b9   : > { %v261_v23 = vadd.f32 %v440_v17, %v260_v21 }
 0x1bb   : > { %v265_v25 = vsel %vm264_vm5, %v440_v17, %v261_v23 }
 0x1bc   : > { %v270_v26 = vsel %vm267_vm6, %v269_v24, %v265_v25 }
 0x1bd   : > { %v272_v27 = vperm.slane %v270_v26, 0 }
 0x1bf   : > { %277 = vperm.xlu0 %436, %v272_v27  }
 0x231   : > { %v278_v28 = vpop.permute.xlu0 %277 }
 0x232   : > { %v279_v29 = vmul.f32 %v278_v28, %v189_v0  ;;  %v280_v30 = vmul.f32 %v278_v28, %v190_v1 }
 0x234   : > { %281 = vst [vmem:[%s188_s11] sm:$0xff] %v279_v29 }
 0x235   : > { %282 = vst [vmem:[%s188_s11 + $0x8] sm:$0xff] %v280_v30 }
 0x236   : > { %498 = shalt.err (!%p495_p4)
}
 0x237   : > { %392 = dma.vmem_to_hbm [thread:$0]  (%p609_p11), %s298_s17, 256, %s300_s19, %s284_s20  }
 0x238 PF: > { %s311_s26 = sand.u32 1, %s525_s12   ;;  %p705_p7 = scmp.ge.s32.totalorder %s537_s15, 2 }
 0x239   : > { %s312_s5 = scalar_lea.sflag [#allocation4], %s311_s26 }
 0x23a   : > { %p399_p5 = pnand %p705_p7, %p613_p12 }
 0x23c   : > { %p400_p8 = pneg %p399_p5 }
 0x23e   : > { %520 = dma.done.wait (%p400_p8), %s312_s5, 256  }
 0x23f   : > { %522 = vsyncadd (%p400_p8), %s312_s5, 4294967040  ;;  %p16_p10 = scmp.ge.s32.totalorder %s584_s18, 4   ;;  %s706_s12 = smov %s529_s13 }
 0x240   : > { %s707_s13 = smov %s533_s14  ;;  %s708_s14 = smov %s596_s21 }
 0x241   : > { %s709_s15 = smov %s584_s18  ;;  %18 = sbr.rel (!%p16_p10) target bundleno = 5 (0x5), region = 77 }
 0x246   :  { %318 = vsyncpa [#allocation3], 1 }
 0x247   :  { %320 = vsyncpa [#allocation3 + $0x1], 1 }
 0x248   :  { %321 = vsyncpa [#allocation4], 1 }
 0x249   :  { %323 = vsyncpa [#allocation4 + $0x1], 1 }

</bundles_post_ra>
